<compile_context>
chip_gen: v7x
topology: tpu7x:2x2x1
jax: 0.10.0
libtpu: 0.0.40
codegen_flags: <defaults>
</compile_context>

<pallas_src>
import functools

import jax
import jax.numpy as jnp
from jax.experimental import pallas as pl
from jax.experimental.pallas import tpu as pltpu

LANE = 128       # lane width: every feature axis is zero-padded to a 128 multiple
ROW_TILE = 256   # MXU-friendly row tile (256x256 MXU on v6e/v7x; 2x128 on v5e)


def _round_up(v, m):
    return ((v + m - 1) // m) * m


# ---------------------------------------------------------------------------
# Kernel A: neighbourhood aggregation  out = D^-1/2 (A+I) S + b   (row/K tiled)
#           where S = D^-1/2 (H @ W) was produced by kernel B (already scaled).
# ---------------------------------------------------------------------------
def gcn_aggregate_kernel(adj_ref, s_ref, dinv_ref, b_ref,
                         out_ref, colsum_ref, acc_ref, *, apply_relu):
    """adj_ref: [TM,TK] i8 | s_ref: [TK,P] bf16 | dinv_ref: [TM,1] f32 |
    b_ref: [1,P] f32 | out_ref: [TM,P] f32 | colsum_ref: [1,1,P] f32 |
    acc_ref: [TM,P] f32 VMEM accumulator (resident across the K axis)."""
    k = pl.program_id(1)

    @pl.when(k == 0)
    def _():
        acc_ref[...] = jnp.zeros_like(acc_ref)

    # int8 0/1 adjacency tile -> bf16 in VMEM just before the MXU dot
    # (two-step cast via f32 for robust lowering; cheap VALU, hidden under MXU).
    a = adj_ref[...].astype(jnp.float32).astype(jnp.bfloat16)
    acc_ref[...] += jnp.dot(a, s_ref[...], preferred_element_type=jnp.float32)

    @pl.when(k == pl.num_programs(1) - 1)
    def _():
        dinv = dinv_ref[...]                                   # [TM, 1] f32
        # bias only on real rows (padded rows have dinv == 0 -> stay exactly 0,
        # keeping the PairNorm column sums uncontaminated).
        out = dinv * acc_ref[...] + jnp.where(dinv > 0, b_ref[...], 0.0)
        if apply_relu:
            out = jnp.maximum(out, 0.0)
        out_ref[...] = out
        # Per-row-tile column sums; the global PairNorm mean is finished in JAX
        # (cannot be accumulated in-kernel across a "parallel" row axis).
        colsum_ref[...] = jnp.sum(out, axis=0, keepdims=True).reshape(
            colsum_ref.shape)


def gcn_aggregate(adj_i8, s_bf16, d_inv, bias, *, apply_relu, tm, tk):
    n_pad = adj_i8.shape[0]
    p = s_bf16.shape[1]
    r, kk = n_pad // tm, n_pad // tk
    kernel = functools.partial(gcn_aggregate_kernel, apply_relu=apply_relu)

    # footprint: double-buffered inputs/outputs + accumulator scratch.
    footprint = (2 * (tm * tk                 # int8 adj tiles
                      + tk * p * 2            # bf16 S tiles
                      + tm * 4 + p * 4        # d_inv + bias
                      + tm * p * 4 + p * 4)   # conv out + colsum blocks
                 + tm * p * 4)                # accumulator scratch
    vmem_limit = int(min(max(2 * footprint, 32 << 20), 48 << 20))

    out, colsum = pl.pallas_call(
        kernel,
        out_shape=(jax.ShapeDtypeStruct((n_pad, p), jnp.float32),
                   jax.ShapeDtypeStruct((r, 1, p), jnp.float32)),
        grid_spec=pltpu.PrefetchScalarGridSpec(
            num_scalar_prefetch=0,
            grid=(r, kk),                                     # K (reduction) last
            in_specs=[
                pl.BlockSpec((tm, tk), lambda i, k: (i, k)),      # adj int8 tile
                pl.BlockSpec((tk, p), lambda i, k: (k, 0)),       # S K-slice
                pl.BlockSpec((tm, 1), lambda i, k: (i, 0)),       # d^-1/2 rows
                pl.BlockSpec((1, p), lambda i, k: (0, 0)),        # bias
            ],
            out_specs=(
                pl.BlockSpec((tm, p), lambda i, k: (i, 0)),       # conv out
                pl.BlockSpec((1, 1, p), lambda i, k: (i, 0, 0)),  # col sums
            ),
            scratch_shapes=[pltpu.VMEM((tm, p), jnp.float32)],
        ),
        compiler_params=pltpu.CompilerParams(
            dimension_semantics=("parallel", "arbitrary"),
            vmem_limit_bytes=vmem_limit),
        cost_estimate=pl.CostEstimate(
            flops=2 * n_pad * n_pad * p,
            transcendentals=0,
            bytes_accessed=n_pad * n_pad + r * n_pad * p * 2
                           + n_pad * p * 4 + r * p * 4),
    )(adj_i8, s_bf16, d_inv, bias)
    return out, colsum


# ---------------------------------------------------------------------------
# Kernel B: PairNorm (PN-SI) + next layer's projection  S = D^-1/2 (PN(H) @ W)
# ---------------------------------------------------------------------------
def pairnorm_project_kernel(h_ref, mean_ref, w_ref, dinv_ref, s_ref, *,
                            apply_pairnorm):
    h = h_ref[...]                                            # [TM, Pin] f32
    if apply_pairnorm:
        c = h - mean_ref[...]
        inv_norm = jax.lax.rsqrt(1e-6 + jnp.sum(c * c, axis=1, keepdims=True))
        h = c * inv_norm                                      # rsqrt -> EUP slot
    xw = jnp.dot(h.astype(jnp.bfloat16), w_ref[...],
                 preferred_element_type=jnp.float32)
    s_ref[...] = (dinv_ref[...] * xw).astype(s_ref.dtype)


def pairnorm_project(h, col_mean, w_bf16, d_inv, *, apply_pairnorm, tm):
    n_pad, p_in = h.shape
    p_out = w_bf16.shape[1]
    r = n_pad // tm
    kernel = functools.partial(pairnorm_project_kernel,
                               apply_pairnorm=apply_pairnorm)
    return pl.pallas_call(
        kernel,
        out_shape=jax.ShapeDtypeStruct((n_pad, p_out), jnp.bfloat16),
        grid_spec=pltpu.PrefetchScalarGridSpec(
            num_scalar_prefetch=0,
            grid=(r,),
            in_specs=[
                pl.BlockSpec((tm, p_in), lambda i: (i, 0)),
                pl.BlockSpec((1, p_in), lambda i: (0, 0)),
                pl.BlockSpec((p_in, p_out), lambda i: (0, 0)),
                pl.BlockSpec((tm, 1), lambda i: (i, 0)),
            ],
            out_specs=pl.BlockSpec((tm, p_out), lambda i: (i, 0)),
        ),
        compiler_params=pltpu.CompilerParams(
            dimension_semantics=("parallel",),
            vmem_limit_bytes=32 << 20),
        cost_estimate=pl.CostEstimate(
            flops=2 * n_pad * p_in * p_out,
            transcendentals=n_pad if apply_pairnorm else 0,
            bytes_accessed=n_pad * p_in * 4 + p_in * p_out * 2
                           + n_pad * p_out * 2),
    )(h, col_mean, w_bf16, d_inv)


# ---------------------------------------------------------------------------
# Kernel C: final PairNorm + sigmoid (bf16 output, lane-dense)
# ---------------------------------------------------------------------------
def pairnorm_sigmoid_kernel(h_ref, mean_ref, out_ref, *, apply_pairnorm):
    h = h_ref[...]
    if apply_pairnorm:
        c = h - mean_ref[...]
        inv_norm = jax.lax.rsqrt(1e-6 + jnp.sum(c * c, axis=1, keepdims=True))
        h = c * inv_norm
    out_ref[...] = jax.nn.sigmoid(h).astype(out_ref.dtype)


def pairnorm_sigmoid(h, col_mean, *, apply_pairnorm, tm):
    n_pad, p = h.shape
    r = n_pad // tm
    kernel = functools.partial(pairnorm_sigmoid_kernel,
                               apply_pairnorm=apply_pairnorm)
    return pl.pallas_call(
        kernel,
        out_shape=jax.ShapeDtypeStruct((n_pad, p), jnp.bfloat16),
        grid_spec=pltpu.PrefetchScalarGridSpec(
            num_scalar_prefetch=0,
            grid=(r,),
            in_specs=[
                pl.BlockSpec((tm, p), lambda i: (i, 0)),
                pl.BlockSpec((1, p), lambda i: (0, 0)),
            ],
            out_specs=pl.BlockSpec((tm, p), lambda i: (i, 0)),
        ),
        compiler_params=pltpu.CompilerParams(
            dimension_semantics=("parallel",),
            vmem_limit_bytes=32 << 20),
        cost_estimate=pl.CostEstimate(
            flops=8 * n_pad * p,
            transcendentals=n_pad * (p + 1),
            bytes_accessed=n_pad * p * 4 + n_pad * p * 2),
    )(h, col_mean)


# ---------------------------------------------------------------------------
# Forward pass (mirrors ClassificationGCNFromPYG.forward; dropout = identity)
# ---------------------------------------------------------------------------
def classification_gcn_forward(x_feature, adj, params, *, use_pair_norm=True):
    n, f_in = x_feature.shape
    num_layers = len(params)
    dims = [f_in] + [w.shape[1] for (w, _) in params]
    dims_pad = [_round_up(d, LANE) for d in dims]
    num_classes = dims[-1]

    tm = ROW_TILE
    n_pad = _round_up(max(n, tm), tm)
    tk = max(t for t in (2048, 1024, 512, 256) if n_pad % t == 0)

    # Raw 0/1 adjacency (+ self loops) in int8; the GCN normalization is fused
    # in-kernel via D^-1/2 row scaling (no f32 N^2 A_hat is ever materialized).
    a_plus = jnp.minimum(adj.astype(jnp.int8) + jnp.eye(n, dtype=jnp.int8),
                         1).astype(jnp.int8)
    adj_i8 = jnp.zeros((n_pad, n_pad), jnp.int8).at[:n, :n].set(a_plus)
    deg = jnp.sum(a_plus.astype(jnp.float32), axis=1)
    dinv = jax.lax.rsqrt(jnp.maximum(deg, 1e-12))
    dinv = jnp.zeros((n_pad, 1), jnp.float32).at[:n, 0].set(dinv)

    x_pad = jnp.zeros((n_pad, dims_pad[0]), jnp.float32).at[:n, :f_in].set(
        x_feature.astype(jnp.float32))

    w_pads, b_pads = [], []
    for l, (w, b) in enumerate(params):
        wp = jnp.zeros((dims_pad[l], dims_pad[l + 1]), jnp.bfloat16)
        w_pads.append(wp.at[:w.shape[0], :w.shape[1]].set(w.astype(jnp.bfloat16)))
        bp = jnp.zeros((1, dims_pad[l + 1]), jnp.float32)
        b_pads.append(bp.at[0, :b.shape[0]].set(b.astype(jnp.float32)))

    # Layer-0 projection: S = D^-1/2 (X @ W0)
    zero_mean = jnp.zeros((1, dims_pad[0]), jnp.float32)
    s = pairnorm_project(x_pad, zero_mean, w_pads[0], dinv,
                         apply_pairnorm=False, tm=tm)

    out_pad = None
    for l in range(num_layers):
        apply_relu = (l != num_layers - 1)
        h, colsum = gcn_aggregate(adj_i8, s, dinv, b_pads[l],
                                  apply_relu=apply_relu, tm=tm, tk=tk)
        p_l = dims_pad[l + 1]
        if use_pair_norm:
            col_mean = (jnp.sum(colsum, axis=0) / n).astype(jnp.float32)
        else:
            col_mean = jnp.zeros((1, p_l), jnp.float32)
        if l != num_layers - 1:
            s = pairnorm_project(h, col_mean, w_pads[l + 1], dinv,
                                 apply_pairnorm=use_pair_norm, tm=tm)
        else:
            out_pad = pairnorm_sigmoid(h, col_mean,
                                       apply_pairnorm=use_pair_norm, tm=tm)

    return out_pad[:n, :num_classes].astype(jnp.float32)


# ---------------------------------------------------------------------------
# Parameter init + pure-JAX reference (validation)
# ---------------------------------------------------------------------------
def glorot_uniform(key, shape):
    fan_in, fan_out = shape
    limit = jnp.sqrt(6.0 / (fan_in + fan_out))
    return jax.random.uniform(key, shape, jnp.float32, -limit, limit)


def make_params(key, input_feature_dim, hidden_layer_dim, num_of_hidden_layer,
                num_of_class):
    dims = ([input_feature_dim] + [hidden_layer_dim] * (num_of_hidden_layer - 1)
            + [num_of_class])
    params = []
    for i in range(num_of_hidden_layer):
        key, sub = jax.random.split(key)
        w = glorot_uniform(sub, (dims[i], dims[i + 1]))
        b = jnp.zeros((dims[i + 1],), jnp.float32)
        params.append((w, b))
    return params


def reference_forward(x, adj, params, *, use_pair_norm=True):
    """f32 JAX mirror of the PyTorch module (GCNConv + PairNorm-SI + sigmoid)."""
    n = x.shape[0]
    a = adj + jnp.eye(n, dtype=adj.dtype)
    d = jnp.sum(a, axis=1)
    dis = 1.0 / jnp.sqrt(jnp.maximum(d, 1e-12))
    a_hat = dis[:, None] * a * dis[None, :]
    h = x
    num_layers = len(params)
    for i, (w, b) in enumerate(params):
        h = a_hat @ (h @ w) + b
        if i != num_layers - 1:
            h = jnp.maximum(h, 0.0)
        if use_pair_norm:
            h = h - jnp.mean(h, axis=0, keepdims=True)
            h = h / jnp.sqrt(1e-6 + jnp.sum(h * h, axis=1, keepdims=True))
    return jax.nn.sigmoid(h)


if __name__ == "__main__":
    # Small synthetic config consistent with the module's constructor.
    N = 128
    input_feature_dim = 64
    hidden_layer_dim = 32
    num_of_hidden_layer = 3
    num_of_class = 7

    key = jax.random.PRNGKey(0)
    k_x, k_adj, k_params = jax.random.split(key, 3)

    x_feature = jax.random.normal(k_x, (N, input_feature_dim), jnp.float32)

    # Random symmetric binary adjacency (no self loops; normalization adds them).
    upper = (jax.random.uniform(k_adj, (N, N)) < 0.05).astype(jnp.float32)
    adj = jnp.triu(upper, k=1)
    adj = adj + adj.T

    params = make_params(k_params, input_feature_dim, hidden_layer_dim,
                         num_of_hidden_layer, num_of_class)

    out = classification_gcn_forward(x_feature, adj, params, use_pair_norm=True)
    out = jax.block_until_ready(out)

    assert out.shape == (N, num_of_class)
    assert bool(jnp.all(jnp.isfinite(out)))
    assert bool(jnp.all((out >= 0.0) & (out <= 1.0)))

    ref = reference_forward(x_feature, adj, params, use_pair_norm=True)
    max_err = float(jnp.max(jnp.abs(out - ref)))
    assert max_err < 5e-2, f"max abs err vs f32 reference: {max_err}"

    print("KERNEL_OK")
</pallas_src>

<mosaic_0001>
module attributes {stable_mosaic.version = 11 : i64} {
  func.func @pairnorm_project_kernel(%arg0: i32, %arg1: memref<256x128xf32, #tpu.memory_space<vmem>>, %arg2: memref<1x128xf32, #tpu.memory_space<vmem>>, %arg3: memref<128x128xbf16, #tpu.memory_space<vmem>>, %arg4: memref<256x1xf32, #tpu.memory_space<vmem>>, %arg5: memref<256x128xbf16, #tpu.memory_space<vmem>>) attributes {dimension_semantics = [#tpu.dimension_semantics<parallel>], iteration_bounds = array<i64: 1>, scalar_prefetch = 0 : i64, scratch_operands = 0 : i64, tpu.core_type = #tpu.core_type<tc>, window_params = [{transform_indices = @transform_0, window_bounds = array<i64: 256, 128>}, {pipeline_mode = #tpu.pipeline_mode<synchronous>, transform_indices = @transform_1, window_bounds = array<i64: 1, 128>}, {pipeline_mode = #tpu.pipeline_mode<synchronous>, transform_indices = @transform_2, window_bounds = array<i64: 128, 128>}, {transform_indices = @transform_3, window_bounds = array<i64: 256, 1>}, {transform_indices = @transform_4, window_bounds = array<i64: 256, 128>}]} {
    %c0 = arith.constant 0 : index
    %c0_0 = arith.constant 0 : index
    %0 = vector.load %arg1[%c0, %c0_0] : memref<256x128xf32, #tpu.memory_space<vmem>>, vector<256x128xf32>
    %1 = arith.truncf %0 : vector<256x128xf32> to vector<256x128xbf16>
    %c0_1 = arith.constant 0 : index
    %c0_2 = arith.constant 0 : index
    %2 = vector.load %arg3[%c0_1, %c0_2] : memref<128x128xbf16, #tpu.memory_space<vmem>>, vector<128x128xbf16>
    %cst = arith.constant dense<0.000000e+00> : vector<256x128xf32>
    %3 = tpu.matmul %1, %2, %cst {dimension_numbers = #tpu.dot_dimension_numbers<[1], [0], [0], [1], [0, 0, 1, 1], [], []>} : vector<256x128xbf16>, vector<128x128xbf16>, vector<256x128xf32> -> vector<256x128xf32>
    %c0_3 = arith.constant 0 : index
    %c0_4 = arith.constant 0 : index
    %4 = vector.load %arg4[%c0_3, %c0_4] : memref<256x1xf32, #tpu.memory_space<vmem>>, vector<256x1xf32>
    %5 = vector.broadcast %4 : vector<256x1xf32> to vector<256x128xf32>
    %6 = arith.mulf %5, %3 : vector<256x128xf32>
    %7 = arith.truncf %6 : vector<256x128xf32> to vector<256x128xbf16>
    %c0_5 = arith.constant 0 : index
    %c0_6 = arith.constant 0 : index
    %8 = vector.load %arg5[%c0_5, %c0_6] : memref<256x128xbf16, #tpu.memory_space<vmem>>, vector<256x128xbf16>
    tpu.vector_store %arg5[%c0_5, %c0_6], %7 {strides = array<i32>} : memref<256x128xbf16, #tpu.memory_space<vmem>>, vector<256x128xbf16>,
    return
  }
  func.func @transform_0(%arg0: i32) -> (i32, i32) {
    %c0_i32 = arith.constant 0 : i32
    %c0_i32_0 = arith.constant 0 : i32
    return %arg0, %c0_i32 : i32, i32
  }
  func.func @transform_1(%arg0: i32) -> (i32, i32) {
    %c0_i32 = arith.constant 0 : i32
    %c0_i32_0 = arith.constant 0 : i32
    %c0_i32_1 = arith.constant 0 : i32
    return %c0_i32, %c0_i32_0 : i32, i32
  }
  func.func @transform_2(%arg0: i32) -> (i32, i32) {
    %c0_i32 = arith.constant 0 : i32
    %c0_i32_0 = arith.constant 0 : i32
    %c0_i32_1 = arith.constant 0 : i32
    return %c0_i32, %c0_i32_0 : i32, i32
  }
  func.func @transform_3(%arg0: i32) -> (i32, i32) {
    %c0_i32 = arith.constant 0 : i32
    %c0_i32_0 = arith.constant 0 : i32
    return %arg0, %c0_i32 : i32, i32
  }
  func.func @transform_4(%arg0: i32) -> (i32, i32) {
    %c0_i32 = arith.constant 0 : i32
    %c0_i32_0 = arith.constant 0 : i32
    return %arg0, %c0_i32 : i32, i32
  }
}

</mosaic_0001>

<bundles_post_ra>
// kernel: tpu_custom_call.1
= control target key start
LH: loop header
LB: loop body
LE: loop exit
PB: predicated region body
PF: predicated region fallthrough
CT: control target
= control target key end

     0   :  { %9 = vsyncpa [#allocation3], 0  ;;  %s1307_s0 = inlined_call_operand.vmem [shape: f32[256,128], index: 0, kind: input, shape index: {}]   ;;  %s1308_s1 = inlined_call_operand.vmem [shape: f32[1,128], index: 1, kind: input, shape index: {}]   ;;  %s1309_s2 = inlined_call_operand.hbm [shape: bf16[128,128], index: 2, kind: input, shape index: {}]   ;;  %s1310_s3 = inlined_call_operand.vmem [shape: f32[256,1], index: 3, kind: input, shape index: {}]   ;;  %s1311_s4 = inlined_call_operand.hbm [shape: bf16[256,128], index: 4, kind: output, shape index: {}]  }
   0x1   :  { %10 = vsyncpa [#allocation4], 0  ;;  %s1025_s15 = smov [#allocation2]   ;;  %s977_s19 = scalar_lea.hbm %s1309_s2, 1024 }
   0x2   :  { %s20_s16 = sshll.u32 %s1025_s15, 4  ;;  %p978_p0 = scmp.ne.s32.totalorder %s1309_s2, %s977_s19  ;;  %s21_s16 = int_to_ptr.vmem [resolvable:$true] %s20_s16 }
   0x3   :  { %p981_p1 = scmp.lt.u32.totalorder %s977_s19, %s1309_s2 }
   0x5   :  { %p983_p2 = pnand %p981_p1, %p978_p0 }
   0x7   :  { %986 = shalt.err (!%p983_p2)
}
   0x8   :  { %s987_s23 = scalar_lea.vmem %s21_s16, 1024  ;;  %p992_p4 = scmp.lt.s32.totalorder %s21_s16, %s21_s16 }
   0x9   :  { %p988_p3 = scmp.ne.s32.totalorder %s21_s16, %s987_s23  ;;  %p993_p5 = scmp.lt.s32.totalorder %s987_s23, %s987_s23 }
   0xb   :  { %p994_p6 = por %p993_p5, %p992_p4 }
   0xd   :  { %p995_p7 = pnand %p994_p6, %p988_p3 }
   0xf   :  { %998 = shalt.err (!%p995_p7)
}
  0x10   :  { %s1026_s24 = smov 64   ;;  %s1027_s25 = smov 4  }
  0x11   :  { %26 = dma.hbm_to_vmem [thread:$0]  %s1309_s2, 1024, %s21_s16, [#allocation3], %s1026_s24, %s1026_s24, %s1027_s25  }
  0x12   :  { %1021 = dma.done.wait [#allocation3], 1024  }
  0x13   :  { %1022 = vsyncadd [#allocation3], 4294966272  ;;  %v1028_v0 = vmov 0   ;;  %v969_v1 = vld [vmem:[#allocation2] sm:$0xff]   ;;  %v970_v2 = vld [vmem:[#allocation2 + $0x8] sm:$0xff]  }
  0x14   :  { %968 = vset.pattern.permute.xlu1 %v1028_v0  ;;  %967 = vset.pattern.permute.xlu0 %v1028_v0  ;;  %v971_v3 = vld [vmem:[#allocation2 + $0x10] sm:$0xff]   ;;  %v306_v5 = vld [vmem:[%s1310_s3] sm:$0xff]  ;;  %v972_v6 = vld [vmem:[#allocation2 + $0x18] sm:$0xff]  }
  0x15   :  { %898 = vmatprep.subr.bf16.mxu0 %v969_v1  ;;  %946 = vmatprep.subr.bf16.mxu1 %v969_v1  ;;  %v308_v4 = vld [vmem:[%s1310_s3 + $0x10] sm:$0xff]  ;;  %v309_v7 = vld [vmem:[%s1310_s3 + $0x18] sm:$0xff]  ;;  %v307_v8 = vld [vmem:[%s1310_s3 + $0x8] sm:$0xff] }
  0x16   :  { %899 = vmatpush3.bf16.msra.mxu0 %v969_v1  ;;  %954 = vmatpush3.bf16.msra.mxu1 %v969_v1  ;;  %v33_v9 = vld [vmem:[%s1307_s0] sm:$0xff]  ;;  %v34_v10 = vld [vmem:[%s1307_s0 + $0x8] sm:$0xff]  ;;  %v313_v19 = vld [vmem:[%s1310_s3 + $0x38] sm:$0xff] }
  0x17   :  { %900 = vmatprep.subr.bf16.mxu0 %v970_v2  ;;  %947 = vmatprep.subr.bf16.mxu1 %v970_v2  ;;  %v49_v11 = vld [vmem:[%s1307_s0 + $0x80] sm:$0xff]  ;;  %v65_v12 = vpack.c.bf16 %v34_v10, %v33_v9  ;;  %v50_v13 = vld [vmem:[%s1307_s0 + $0x88] sm:$0xff]  ;;  %v312_v20 = vld [vmem:[%s1310_s3 + $0x30] sm:$0xff] }
  0x18   :  { %350 = vperm.xlu1 %968, %v308_v4   ;;  %340 = vperm.xlu0 %967, %v306_v5   ;;  %v973_v14 = vld [vmem:[#allocation2 + $0x20] sm:$0xff]   ;;  %v73_v15 = vpack.c.bf16 %v50_v13, %v49_v11  ;;  %v311_v16 = vld [vmem:[%s1310_s3 + $0x28] sm:$0xff]  ;;  %v975_v21 = vld [vmem:[#allocation2 + $0x30] sm:$0xff]  }
  0x19   :  { %v310_v17 = vld [vmem:[%s1310_s3 + $0x20] sm:$0xff]  ;;  %914 = vmatprep.mubr.bf16.mxu0 %v65_v12  ;;  %v974_v18 = vld [vmem:[#allocation2 + $0x28] sm:$0xff]   ;;  %v976_v24 = vld [vmem:[#allocation2 + $0x38] sm:$0xff]  }
  0x1a   :  { %901 = vmatpush3.bf16.msra.mxu0 %v970_v2  ;;  %955 = vmatpush3.bf16.msra.mxu1 %v970_v2  ;;  %v315_v22 = vld [vmem:[%s1310_s3 + $0x48] sm:$0xff]  ;;  %v314_v23 = vld [vmem:[%s1310_s3 + $0x40] sm:$0xff]  ;;  %v35_v25 = vld [vmem:[%s1307_s0 + $0x10] sm:$0xff] }
  0x1b   :  { %902 = vmatprep.subr.bf16.mxu0 %v971_v3  ;;  %948 = vmatprep.subr.bf16.mxu1 %v971_v3  ;;  %v36_v26 = vld [vmem:[%s1307_s0 + $0x18] sm:$0xff]  ;;  %v316_v28 = vld [vmem:[%s1310_s3 + $0x50] sm:$0xff]  ;;  %v37_v31 = vld [vmem:[%s1307_s0 + $0x20] sm:$0xff] }
  0x1c   :  { %355 = vperm.xlu1 %968, %v309_v7   ;;  %345 = vperm.xlu0 %967, %v307_v8   ;;  %v317_v27 = vld [vmem:[%s1310_s3 + $0x58] sm:$0xff]  ;;  %v51_v29 = vld [vmem:[%s1307_s0 + $0x90] sm:$0xff]  ;;  %v38_v32 = vld [vmem:[%s1307_s0 + $0x28] sm:$0xff]  ;;  %v66_v35 = vpack.c.bf16 %v36_v26, %v35_v25 }
  0x1d   :  { %930 = vmatprep.mubr.bf16.mxu1 %v73_v15  ;;  %v52_v30 = vld [vmem:[%s1307_s0 + $0x98] sm:$0xff]  ;;  %v53_v33 = vld [vmem:[%s1307_s0 + $0xa0] sm:$0xff]  ;;  %v54_v34 = vld [vmem:[%s1307_s0 + $0xa8] sm:$0xff]  ;;  %v67_v39 = vpack.c.bf16 %v38_v32, %v37_v31 }
  0x1e   :  { %903 = vmatpush3.bf16.msra.mxu0 %v971_v3  ;;  %956 = vmatpush3.bf16.msra.mxu1 %v971_v3  ;;  %v74_v36 = vpack.c.bf16 %v52_v30, %v51_v29  ;;  %v319_v37 = vld [vmem:[%s1310_s3 + $0x68] sm:$0xff]  ;;  %v318_v38 = vld [vmem:[%s1310_s3 + $0x60] sm:$0xff]  ;;  %v75_v40 = vpack.c.bf16 %v54_v34, %v53_v33  ;;  %v39_v41 = vld [vmem:[%s1307_s0 + $0x30] sm:$0xff] }
  0x1f   :  { %904 = vmatprep.subr.bf16.mxu0 %v972_v6  ;;  %949 = vmatprep.subr.bf16.mxu1 %v972_v6  ;;  %v40_v42 = vld [vmem:[%s1307_s0 + $0x38] sm:$0xff]  ;;  %v320_v44 = vld [vmem:[%s1310_s3 + $0x70] sm:$0xff]  ;;  %v41_v47 = vld [vmem:[%s1307_s0 + $0x40] sm:$0xff] }
  0x20   :  { %365 = vperm.xlu1 %968, %v311_v16   ;;  %360 = vperm.xlu0 %967, %v310_v17   ;;  %v321_v43 = vld [vmem:[%s1310_s3 + $0x78] sm:$0xff]  ;;  %v55_v45 = vld [vmem:[%s1307_s0 + $0xb0] sm:$0xff]  ;;  %v42_v48 = vld [vmem:[%s1307_s0 + $0x48] sm:$0xff]  ;;  %v68_v51 = vpack.c.bf16 %v40_v42, %v39_v41 }
  0x21   :  { %v56_v46 = vld [vmem:[%s1307_s0 + $0xb8] sm:$0xff]  ;;  %v57_v49 = vld [vmem:[%s1307_s0 + $0xc0] sm:$0xff]  ;;  %v58_v50 = vld [vmem:[%s1307_s0 + $0xc8] sm:$0xff]  ;;  %v69_v55 = vpack.c.bf16 %v42_v48, %v41_v47 }
  0x22   :  { %905 = vmatpush3.bf16.msra.mxu0 %v972_v6  ;;  %957 = vmatpush3.bf16.msra.mxu1 %v972_v6  ;;  %v76_v52 = vpack.c.bf16 %v56_v46, %v55_v45  ;;  %v323_v53 = vld [vmem:[%s1310_s3 + $0x88] sm:$0xff]  ;;  %v322_v54 = vld [vmem:[%s1310_s3 + $0x80] sm:$0xff]  ;;  %v77_v56 = vpack.c.bf16 %v58_v50, %v57_v49  ;;  %v43_v57 = vld [vmem:[%s1307_s0 + $0x50] sm:$0xff] }
  0x23   :  { %906 = vmatprep.subr.bf16.mxu0 %v973_v14  ;;  %950 = vmatprep.subr.bf16.mxu1 %v973_v14  ;;  %v44_v58 = vld [vmem:[%s1307_s0 + $0x58] sm:$0xff]  ;;  %v324_v60 = vld [vmem:[%s1310_s3 + $0x90] sm:$0xff]  ;;  %v45_v63 = vld [vmem:[%s1307_s0 + $0x60] sm:$0xff] }
  0x24   :  { %375 = vperm.xlu1 %968, %v313_v19   ;;  %370 = vperm.xlu0 %967, %v312_v20   ;;  %v325_v59 = vld [vmem:[%s1310_s3 + $0x98] sm:$0xff]  ;;  %v59_v61 = vld [vmem:[%s1307_s0 + $0xd0] sm:$0xff]  ;;  %v46_v0 = vld [vmem:[%s1307_s0 + $0x68] sm:$0xff]  ;;  %v70_v3 = vpack.c.bf16 %v44_v58, %v43_v57 }
  0x25   :  { %v60_v62 = vld [vmem:[%s1307_s0 + $0xd8] sm:$0xff]  ;;  %v61_v1 = vld [vmem:[%s1307_s0 + $0xe0] sm:$0xff]  ;;  %v62_v2 = vld [vmem:[%s1307_s0 + $0xe8] sm:$0xff]  ;;  %v71_v7 = vpack.c.bf16 %v46_v0, %v45_v63 }
  0x26   :  { %907 = vmatpush3.bf16.msra.mxu0 %v973_v14  ;;  %958 = vmatpush3.bf16.msra.mxu1 %v973_v14  ;;  %v78_v4 = vpack.c.bf16 %v60_v62, %v59_v61  ;;  %v327_v5 = vld [vmem:[%s1310_s3 + $0xa8] sm:$0xff]  ;;  %v326_v6 = vld [vmem:[%s1310_s3 + $0xa0] sm:$0xff]  ;;  %v79_v8 = vpack.c.bf16 %v62_v2, %v61_v1  ;;  %v47_v9 = vld [vmem:[%s1307_s0 + $0x70] sm:$0xff] }
  0x27   :  { %908 = vmatprep.subr.bf16.mxu0 %v974_v18  ;;  %951 = vmatprep.subr.bf16.mxu1 %v974_v18  ;;  %v329_v10 = vld [vmem:[%s1310_s3 + $0xb8] sm:$0xff]  ;;  %v328_v11 = vld [vmem:[%s1310_s3 + $0xb0] sm:$0xff]  ;;  %v331_v17 = vld [vmem:[%s1310_s3 + $0xc8] sm:$0xff] }
  0x28   :  { %385 = vperm.xlu1 %968, %v315_v22   ;;  %380 = vperm.xlu0 %967, %v314_v23   ;;  %v48_v12 = vld [vmem:[%s1307_s0 + $0x78] sm:$0xff]  ;;  %v63_v13 = vld [vmem:[%s1307_s0 + $0xf0] sm:$0xff]  ;;  %v334_v22 = vld [vmem:[%s1310_s3 + $0xe0] sm:$0xff] }
  0x29   :  { %v64_v14 = vld [vmem:[%s1307_s0 + $0xf8] sm:$0xff]  ;;  %v72_v15 = vpack.c.bf16 %v48_v12, %v47_v9  ;;  %v332_v20 = vld [vmem:[%s1310_s3 + $0xd0] sm:$0xff] }
  0x2a   :  { %909 = vmatpush3.bf16.msra.mxu0 %v974_v18  ;;  %959 = vmatpush3.bf16.msra.mxu1 %v974_v18  ;;  %v80_v16 = vpack.c.bf16 %v64_v14, %v63_v13  ;;  %v330_v18 = vld [vmem:[%s1310_s3 + $0xc0] sm:$0xff]  ;;  %v333_v19 = vld [vmem:[%s1310_s3 + $0xd8] sm:$0xff] }
  0x2b   :  { %910 = vmatprep.subr.bf16.mxu0 %v975_v21  ;;  %952 = vmatprep.subr.bf16.mxu1 %v975_v21  ;;  %v337_v23 = vld [vmem:[%s1310_s3 + $0xf8] sm:$0xff] }
  0x2c   :  { %395 = vperm.xlu1 %968, %v317_v27   ;;  %390 = vperm.xlu0 %967, %v316_v28  }
  0x2e   :  { %911 = vmatpush3.bf16.msra.mxu0 %v975_v21  ;;  %960 = vmatpush3.bf16.msra.mxu1 %v975_v21  ;;  %v335_v21 = vld [vmem:[%s1310_s3 + $0xe8] sm:$0xff] }
  0x2f   :  { %912 = vmatprep.subr.bf16.mxu0 %v976_v24  ;;  %953 = vmatprep.subr.bf16.mxu1 %v976_v24 }
  0x30   :  { %405 = vperm.xlu1 %968, %v319_v37   ;;  %400 = vperm.xlu0 %967, %v318_v38  }
  0x32   :  { %913 = vmatpush3.bf16.msra.mxu0 %v976_v24  ;;  %961 = vmatpush3.bf16.msra.mxu1 %v976_v24  ;;  %v336_v24 = vld [vmem:[%s1310_s3 + $0xf0] sm:$0xff]  ;;  %s1029_s3 = smov [#allocation5]  }
  0x33   :  { %s695_s23 = sshll.u32 %s1029_s3, 4  ;;  %s696_s23 = int_to_ptr.vmem [resolvable:$true] %s695_s23 }
  0x34   :  { %415 = vperm.xlu1 %968, %v321_v43   ;;  %410 = vperm.xlu0 %967, %v320_v44   ;;  %s999_s26 = scalar_lea.vmem %s696_s23, 2048  ;;  %p1004_p9 = scmp.lt.s32.totalorder %s696_s23, %s696_s23 }
  0x35   :  { %915 = vmatmul.mubr.bf16.vlgmr.msra.gmra.mrb[0].mxu0 %v66_v35  ;;  %931 = vmatmul.mubr.bf16.vlgmr.msra.gmra.mrb[0].mxu1 %v74_v36  ;;  %p1000_p8 = scmp.ne.s32.totalorder %s696_s23, %s999_s26  ;;  %p1005_p10 = scmp.lt.s32.totalorder %s999_s26, %s999_s26 }
  0x36   :  { %918 = vmatprep.mubr.bf16.mxu0 %v67_v39  ;;  %934 = vmatprep.mubr.bf16.mxu1 %v75_v40 }
  0x37   :  { %p1006_p11 = por %p1005_p10, %p1004_p9 }
  0x38   :  { %425 = vperm.xlu1 %968, %v323_v53   ;;  %420 = vperm.xlu0 %967, %v322_v54  }
  0x39   :  { %p1007_p12 = pnand %p1006_p11, %p1000_p8 }
  0x3c   :  { %435 = vperm.xlu1 %968, %v325_v59   ;;  %430 = vperm.xlu0 %967, %v324_v60  }
  0x3d   :  { %919 = vmatmul.mubr.bf16.gmra.mrb[4].mxu0 %v68_v51  ;;  %935 = vmatmul.mubr.bf16.gmra.mrb[4].mxu1 %v76_v52 }
  0x3e   :  { %922 = vmatprep.mubr.bf16.mxu0 %v69_v55  ;;  %938 = vmatprep.mubr.bf16.mxu1 %v77_v56 }
  0x40   :  { %445 = vperm.xlu1 %968, %v327_v5   ;;  %440 = vperm.xlu0 %967, %v326_v6  }
  0x44   :  { %455 = vperm.xlu1 %968, %v329_v10   ;;  %450 = vperm.xlu0 %967, %v328_v11  }
  0x45   :  { %923 = vmatmul.mubr.bf16.gmra.mrb[8].mxu0 %v70_v3  ;;  %939 = vmatmul.mubr.bf16.gmra.mrb[8].mxu1 %v78_v4 }
  0x46   :  { %926 = vmatprep.mubr.bf16.mxu0 %v71_v7  ;;  %942 = vmatprep.mubr.bf16.mxu1 %v79_v8 }
  0x48   :  { %465 = vperm.xlu1 %968, %v331_v17   ;;  %460 = vperm.xlu0 %967, %v330_v18  }
  0x4c   :  { %475 = vperm.xlu1 %968, %v333_v19   ;;  %470 = vperm.xlu0 %967, %v332_v20  }
  0x4d   :  { %927 = vmatmul.mubr.bf16.gmra.mrb[12].mxu0 %v72_v15  ;;  %943 = vmatmul.mubr.bf16.gmra.mrb[12].mxu1 %v80_v16 }
  0x50   :  { %485 = vperm.xlu1 %968, %v335_v21   ;;  %480 = vperm.xlu0 %967, %v334_v22  }
  0x54   :  { %495 = vperm.xlu1 %968, %v337_v23   ;;  %490 = vperm.xlu0 %967, %v336_v24  }
  0x97   :  { %v351_v25 = vpop.permute.xlu1 %350  ;;  %v341_v26 = vpop.permute.xlu0 %340 }
  0x9b   :  { %v356_v27 = vpop.permute.xlu1 %355  ;;  %v346_v28 = vpop.permute.xlu0 %345 }
  0x9f   :  { %v366_v29 = vpop.permute.xlu1 %365  ;;  %v361_v30 = vpop.permute.xlu0 %360 }
  0xa3   :  { %v376_v31 = vpop.permute.xlu1 %375  ;;  %v371_v32 = vpop.permute.xlu0 %370 }
  0xa7   :  { %v1262_v33 = vpop.permute.xlu1 %385  ;;  %v1264_v34 = vpop.permute.xlu0 %380 }
  0xab   :  { %v1266_v35 = vpop.permute.xlu1 %395  ;;  %v1268_v36 = vpop.permute.xlu0 %390 }
  0xaf   :  { %v1270_v37 = vpop.permute.xlu1 %405  ;;  %v1272_v38 = vpop.permute.xlu0 %400 }
  0xb3   :  { %v1274_v39 = vpop.permute.xlu1 %415  ;;  %v1276_v40 = vpop.permute.xlu0 %410 }
  0xb7   :  { %v426_v41 = vpop.permute.xlu1 %425  ;;  %v421_v42 = vpop.permute.xlu0 %420 }
  0xbb   :  { %v436_v43 = vpop.permute.xlu1 %435  ;;  %v431_v44 = vpop.permute.xlu0 %430 }
  0xbf   :  { %v446_v45 = vpop.permute.xlu1 %445  ;;  %v441_v46 = vpop.permute.xlu0 %440 }
  0xc3   :  { %v456_v47 = vpop.permute.xlu1 %455  ;;  %v451_v48 = vpop.permute.xlu0 %450 }
  0xc7   :  { %v1278_v49 = vpop.permute.xlu1 %465  ;;  %v1280_v50 = vpop.permute.xlu0 %460 }
  0xcb   :  { %v476_v7 = vpop.permute.xlu1 %475  ;;  %v471_v8 = vpop.permute.xlu0 %470 }
 0x108   :  { %v916_v51 = vpop.f32.mrb[0].mxu0  ;;  %v932_v52 = vpop.f32.mrb[0].mxu1 }
 0x109   :  { %v179_v53 = vpop.f32.mrb[1].mxu0  ;;  %v243_v54 = vpop.f32.mrb[1].mxu1  ;;  %v500_v57 = vmul.f32 %v916_v51, %v351_v25  ;;  %v516_v58 = vmul.f32 %v932_v52, %v431_v44 }
 0x10a   :  { %v917_v55 = vpop.f32.mrb[2].mxu0  ;;  %v933_v56 = vpop.f32.mrb[2].mxu1  ;;  %v498_v63 = vmul.f32 %v341_v26, %v179_v53  ;;  %v514_v0 = vmul.f32 %v421_v42, %v243_v54 }
 0x10b   :  { %v501_v59 = vmul.f32 %v917_v55, %v356_v27  ;;  %v517_v60 = vmul.f32 %v933_v56, %v436_v43  ;;  %v182_v61 = vpop.f32.mrb[3].mxu0  ;;  %v246_v62 = vpop.f32.mrb[3].mxu1 }
 0x10c   :  { %v499_v1 = vmul.f32 %v346_v28, %v182_v61  ;;  %v515_v2 = vmul.f32 %v426_v41, %v246_v62  ;;  %v486_v41 = vpop.permute.xlu1 %485  ;;  %v481_v42 = vpop.permute.xlu0 %480 }
 0x10d   :  { %v787_v3 = vpack.c.bf16 %v501_v59, %v500_v57  ;;  %v827_v4 = vpack.c.bf16 %v517_v60, %v516_v58 }
 0x10e   :  { %v782_v5 = vpack.c.bf16 %v499_v1, %v498_v63  ;;  %v822_v6 = vpack.c.bf16 %v515_v2, %v514_v0 }
 0x10f   :  { %859 = vst [vmem:[#allocation5 + $0x8] sm:$0xff] %v787_v3   ;;  %867 = vst [vmem:[#allocation5 + $0x48] sm:$0xff] %v827_v4  }
 0x110   :  { %783 = vst [vmem:[#allocation5] sm:$0xff] %v782_v5   ;;  %866 = vst [vmem:[#allocation5 + $0x40] sm:$0xff] %v822_v6   ;;  %v920_v9 = vpop.f32.mrb[4].mxu0  ;;  %v936_v10 = vpop.f32.mrb[4].mxu1 }
 0x111   :  { %v195_v11 = vpop.f32.mrb[5].mxu0  ;;  %v259_v12 = vpop.f32.mrb[5].mxu1  ;;  %v504_v15 = vmul.f32 %v920_v9, %v371_v32  ;;  %v520_v16 = vmul.f32 %v936_v10, %v451_v48 }
 0x112   :  { %v921_v13 = vpop.f32.mrb[6].mxu0  ;;  %v937_v14 = vpop.f32.mrb[6].mxu1  ;;  %v502_v21 = vmul.f32 %v361_v30, %v195_v11  ;;  %v518_v22 = vmul.f32 %v441_v46, %v259_v12 }
 0x113   :  { %v505_v17 = vmul.f32 %v921_v13, %v376_v31  ;;  %v521_v18 = vmul.f32 %v937_v14, %v456_v47  ;;  %v198_v19 = vpop.f32.mrb[7].mxu0  ;;  %v262_v20 = vpop.f32.mrb[7].mxu1 }
 0x114   :  { %v503_v23 = vmul.f32 %v366_v29, %v198_v19  ;;  %v519_v24 = vmul.f32 %v446_v45, %v262_v20  ;;  %v496_v61 = vpop.permute.xlu1 %495 }
 0x115   :  { %v797_v25 = vpack.c.bf16 %v505_v17, %v504_v15  ;;  %v837_v26 = vpack.c.bf16 %v521_v18, %v520_v16 }
 0x116   :  { %v792_v27 = vpack.c.bf16 %v503_v23, %v502_v21  ;;  %v832_v28 = vpack.c.bf16 %v519_v24, %v518_v22 }
 0x117   :  { %861 = vst [vmem:[#allocation5 + $0x18] sm:$0xff] %v797_v25   ;;  %869 = vst [vmem:[#allocation5 + $0x58] sm:$0xff] %v837_v26  }
 0x118   :  { %860 = vst [vmem:[#allocation5 + $0x10] sm:$0xff] %v792_v27   ;;  %868 = vst [vmem:[#allocation5 + $0x50] sm:$0xff] %v832_v28   ;;  %v924_v32 = vpop.f32.mrb[8].mxu0  ;;  %v940_v43 = vpop.f32.mrb[8].mxu1 }
 0x119   :  { %v211_v31 = vpop.f32.mrb[9].mxu0  ;;  %v275_v44 = vpop.f32.mrb[9].mxu1  ;;  %v508_v30 = vmul.f32 %v924_v32, %v1268_v36  ;;  %v524_v29 = vmul.f32 %v940_v43, %v471_v8 }
 0x11a   :  { %v925_v47 = vpop.f32.mrb[10].mxu0  ;;  %v941_v48 = vpop.f32.mrb[10].mxu1  ;;  %v506_v53 = vmul.f32 %v1264_v34, %v211_v31  ;;  %v522_v54 = vmul.f32 %v1280_v50, %v275_v44 }
 0x11b   :  { %v509_v45 = vmul.f32 %v925_v47, %v1266_v35  ;;  %v525_v46 = vmul.f32 %v941_v48, %v476_v7  ;;  %v214_v51 = vpop.f32.mrb[11].mxu0  ;;  %v278_v52 = vpop.f32.mrb[11].mxu1 }
 0x11c   :  { %v507_v55 = vmul.f32 %v1262_v33, %v214_v51  ;;  %v523_v56 = vmul.f32 %v1278_v49, %v278_v52  ;;  %v491_v36 = vpop.permute.xlu0 %490 }
 0x11d   :  { %v807_v57 = vpack.c.bf16 %v509_v45, %v508_v30  ;;  %v847_v58 = vpack.c.bf16 %v525_v46, %v524_v29 }
 0x11e   :  { %v802_v59 = vpack.c.bf16 %v507_v55, %v506_v53  ;;  %v842_v60 = vpack.c.bf16 %v523_v56, %v522_v54 }
 0x11f   :  { %863 = vst [vmem:[#allocation5 + $0x28] sm:$0xff] %v807_v57   ;;  %871 = vst [vmem:[#allocation5 + $0x68] sm:$0xff] %v847_v58  }
 0x120   :  { %862 = vst [vmem:[#allocation5 + $0x20] sm:$0xff] %v802_v59   ;;  %870 = vst [vmem:[#allocation5 + $0x60] sm:$0xff] %v842_v60   ;;  %v928_v35 = vpop.f32.mrb[12].mxu0  ;;  %v944_v62 = vpop.f32.mrb[12].mxu1 }
 0x121   :  { %v227_v63 = vpop.f32.mrb[13].mxu0  ;;  %v291_v34 = vpop.f32.mrb[13].mxu1  ;;  %v512_v33 = vmul.f32 %v928_v35, %v1276_v40  ;;  %v528_v1 = vmul.f32 %v944_v62, %v491_v36 }
 0x122   :  { %v929_v0 = vpop.f32.mrb[14].mxu0  ;;  %v945_v50 = vpop.f32.mrb[14].mxu1  ;;  %v510_v5 = vmul.f32 %v1272_v38, %v227_v63  ;;  %v526_v6 = vmul.f32 %v481_v42, %v291_v34 }
 0x123   :  { %v513_v49 = vmul.f32 %v929_v0, %v1274_v39  ;;  %v529_v2 = vmul.f32 %v945_v50, %v496_v61  ;;  %v230_v3 = vpop.f32.mrb[15].mxu0  ;;  %v294_v4 = vpop.f32.mrb[15].mxu1 }
 0x124   :  { %v511_v7 = vmul.f32 %v1270_v37, %v230_v3  ;;  %v527_v8 = vmul.f32 %v486_v41, %v294_v4 }
 0x125   :  { %v817_v9 = vpack.c.bf16 %v513_v49, %v512_v33  ;;  %v857_v10 = vpack.c.bf16 %v529_v2, %v528_v1 }
 0x126   :  { %v812_v11 = vpack.c.bf16 %v511_v7, %v510_v5  ;;  %v852_v12 = vpack.c.bf16 %v527_v8, %v526_v6 }
 0x127   :  { %865 = vst [vmem:[#allocation5 + $0x38] sm:$0xff] %v817_v9   ;;  %873 = vst [vmem:[#allocation5 + $0x78] sm:$0xff] %v857_v10  }
 0x128   :  { %864 = vst [vmem:[#allocation5 + $0x30] sm:$0xff] %v812_v11   ;;  %872 = vst [vmem:[#allocation5 + $0x70] sm:$0xff] %v852_v12  }
 0x129   :  { %1010 = shalt.err (!%p1007_p12)
}
 0x12a   :  { %s1011_s29 = scalar_lea.hbm %s1311_s4, 2048 }
 0x12b   :  { %p1012_p13 = scmp.ne.s32.totalorder %s1311_s4, %s1011_s29  ;;  %p1015_p0 = scmp.lt.u32.totalorder %s1011_s29, %s1311_s4 }
 0x12d   :  { %p1017_p1 = pnand %p1015_p0, %p1012_p13 }
 0x12f   :  { %1020 = shalt.err (!%p1017_p1)
}
 0x130   :  { %701 = dma.vmem_to_hbm [thread:$0]  %s696_s23, 2048, %s1311_s4, [#allocation4], %s1026_s24, %s1026_s24, %s1027_s25  }
 0x131   :  { %1023 = dma.done.wait [#allocation4], 2048  }
 0x132   :  { %1024 = vsyncadd [#allocation4], 4294965248 }
 0x133   :  { %705 = vsyncpa [#allocation3], 1 }
 0x134   :  { %706 = vsyncpa [#allocation4], 1 }

</bundles_post_ra>
